<compile_context>
chip_gen: v7x
topology: tpu7x:2x2x1
jax: 0.10.0
libtpu: 0.0.40
codegen_flags: <defaults>
</compile_context>

<pallas_src>
import functools

import jax
import jax.numpy as jnp
from jax import lax
from jax.experimental import pallas as pl
from jax.experimental.pallas import tpu as pltpu


_MIB = 1024 * 1024
_HEADROOM_BYTES = 4 * _MIB          # Mosaic internal scratch / semaphores


def _round_up(n, m):
    return ((n + m - 1) // m) * m


def _vmem_budget_bytes():
    """Generation-aware VMEM budget (~3/4 of physical VMEM per core).

    v5e/v6e: 128 MiB physical -> 96 MiB budget; v7x: 64 MiB -> 48 MiB.
    Falls back to the most conservative (v7x) figure if the query fails.
    """
    cap = None
    try:
        info = pltpu.get_tpu_info()
        for attr in ("vmem_capacity_bytes", "vmem_bytes", "vmem_size_bytes"):
            cap = getattr(info, attr, None)
            if cap:
                break
    except Exception:
        cap = None
    if not cap:
        cap = 64 * _MIB
    return min((int(cap) * 3) // 4, 112 * _MIB)


# ----------------------------- fused single pass -----------------------------

def _se_fused_kernel(x_ref, w1a_ref, w1m_ref, w2_ref, o_ref):
    # x_ref: (BT, C, HW) block, kept in its native dtype.
    inv_hw = 1.0 / x_ref.shape[-1]

    # Squeeze: adaptive avg / max pool over the spatial (lane) axis -> (BT, C).
    x = x_ref[...]
    avg = jnp.sum(x, axis=-1, dtype=jnp.float32) * inv_hw
    mx = jnp.max(x, axis=-1).astype(jnp.float32)

    # Excite: fc1 (w1 pre-split into avg/max halves, no lane concat) + ReLU,
    # then fc2 + sigmoid -> per-(batch, channel) gate in f32.
    h = jnp.maximum(
        jnp.dot(avg, w1a_ref[...], preferred_element_type=jnp.float32)
        + jnp.dot(mx, w1m_ref[...], preferred_element_type=jnp.float32),
        0.0)
    gate = jax.nn.sigmoid(
        jnp.dot(h, w2_ref[...], preferred_element_type=jnp.float32))

    # Scale: re-read x (cheap VMEM load; bounds vreg live ranges across the
    # pool/matmul phases), multiply in f32, cast the product.
    o_ref[...] = (x_ref[...].astype(jnp.float32)
                  * gate[:, :, None]).astype(o_ref.dtype)


# ------------------------------ tiled two pass -------------------------------

def _pool_gate_kernel(x_ref, w1at_ref, w1mt_ref, w2t_ref, g_ref,
                      sum_acc, max_acc, *, hw, thw, mask_last):
    # grid = (B, T); T (spatial tiles) is the last, "arbitrary" axis.
    # Accumulators live in VMEM scratch; the (1, C, 1) gate output block is
    # only written at t == T-1, so the fc1/ReLU/fc2/sigmoid gate is computed
    # here (no XLA gap, no pooled-stats HBM round trip).
    t = pl.program_id(1)

    @pl.when(t == 0)
    def _init():
        sum_acc[...] = jnp.zeros_like(sum_acc)
        max_acc[...] = jnp.full_like(max_acc, -jnp.inf)

    x = x_ref[0]                                           # (C, THW)
    if mask_last:
        # Tiles need not divide HW: mask padded lanes of the trailing tile
        # (zero for the sum, -inf for the max; avg divides by the true HW).
        pos = t * thw + lax.broadcasted_iota(jnp.int32, x.shape, 1)
        valid = pos < hw
        xs = jnp.where(valid, x, 0)
        xm = jnp.where(valid, x, -jnp.inf)
    else:
        xs = x
        xm = x

    sum_acc[...] += jnp.sum(xs, axis=-1, keepdims=True, dtype=jnp.float32)
    max_acc[...] = jnp.maximum(
        max_acc[...], jnp.max(xm, axis=-1, keepdims=True).astype(jnp.float32))

    @pl.when(t == pl.num_programs(1) - 1)
    def _finalize():
        avg = sum_acc[...] * (1.0 / hw)                    # (C, 1) f32
        mx = max_acc[...]                                  # (C, 1) f32
        # Column-vector orientation (transposed weights) so no in-kernel
        # transposes are needed and the gate lands directly in (C, 1) layout.
        h = jnp.maximum(
            jnp.dot(w1at_ref[...], avg, preferred_element_type=jnp.float32)
            + jnp.dot(w1mt_ref[...], mx, preferred_element_type=jnp.float32),
            0.0)                                           # (hidden, 1)
        g_ref[0] = jax.nn.sigmoid(
            jnp.dot(w2t_ref[...], h, preferred_element_type=jnp.float32))


def _scale_kernel(x_ref, g_ref, o_ref):
    # Pure streaming scale: (C, THW) * (C, 1) sublane-broadcast, f32 multiply.
    o_ref[0] = (x_ref[0].astype(jnp.float32) * g_ref[0]).astype(o_ref.dtype)


def _pick_hw_tile(hw, c, itemsize, budget, max_hw_tile):
    """Largest multiple-of-128 spatial tile whose scale-pass footprint
    (in + out blocks, double-buffered: 4 x C x THW x itemsize) fits the VMEM
    budget.  Tiles need not divide HW (cdiv grid + masked last tile)."""
    hw_pad = _round_up(hw, 128)
    lane_budget = max(128, (budget - _HEADROOM_BYTES) // (4 * c * itemsize))
    cap = max(128, (lane_budget // 128) * 128)
    tile_cap = max(128, (max_hw_tile // 128) * 128)
    return max(128, min(hw_pad, cap, tile_cap))


# --------------------------------- wrapper -----------------------------------

def se_forward(x_nchw, w1, w2, *, max_fused_slab_bytes=None, max_hw_tile=8192):
    """x_nchw: (B, C, H, W); w1: (2C, hidden); w2: (hidden, C). Returns NCHW.

    w1/w2 are the transposed nn.Linear weights (fc1.weight.T, fc2.weight.T).
    `max_fused_slab_bytes` overrides the generation-aware fused-path threshold
    (mainly for testing the tiled two-pass path at small shapes).
    """
    B, C, H, W = x_nchw.shape
    HW = H * W
    hidden = w1.shape[1]
    assert w1.shape == (2 * C, hidden)
    assert w2.shape == (hidden, C)

    # Native-layout view: NCHW -> (B, C, HW).  Free reshape, no transpose.
    x3 = x_nchw.reshape(B, C, HW)
    itemsize = x3.dtype.itemsize
    per_batch_bytes = C * HW * itemsize
    weight_bytes = (2 * C * hidden + hidden * C) * w1.dtype.itemsize

    budget = _vmem_budget_bytes()
    vmem_limit = int(budget)

    if max_fused_slab_bytes is None:
        # Fused needs ~2 (in + out) x 2 (double buffer) x slab + weights.
        fused_slab_limit = max(
            0, (budget - 2 * weight_bytes - _HEADROOM_BYTES) // 4)
    else:
        fused_slab_limit = max_fused_slab_bytes

    if 0 < per_batch_bytes <= fused_slab_limit:
        # ---------------- fused single pass (1 HBM read + 1 write) ----------
        w1a = w1[:C]          # avg-pool half of fc1 weight, (C, hidden)
        w1m = w1[C:]          # max-pool half of fc1 weight, (C, hidden)

        # Batch multiple slabs per grid step only while staying inside the
        # VMEM budget AND keeping >= 2 parallel grid steps when B >= 2
        # (v7x has 2 TensorCores; a 1-step grid would idle one of them).
        max_bt = max(1, int(fused_slab_limit // per_batch_bytes))
        if B >= 2:
            max_bt = min(max_bt, B // 2)
        max_bt = max(1, min(max_bt, B))
        BT = max(d for d in range(1, max_bt + 1) if B % d == 0)

        out3 = pl.pallas_call(
            _se_fused_kernel,
            out_shape=jax.ShapeDtypeStruct((B, C, HW), x3.dtype),
            grid_spec=pltpu.PrefetchScalarGridSpec(
                num_scalar_prefetch=0,
                grid=(B // BT,),
                in_specs=[
                    pl.BlockSpec((BT, C, HW), lambda i: (i, 0, 0)),
                    pl.BlockSpec((C, hidden), lambda i: (0, 0)),
                    pl.BlockSpec((C, hidden), lambda i: (0, 0)),
                    pl.BlockSpec((hidden, C), lambda i: (0, 0)),
                ],
                out_specs=pl.BlockSpec((BT, C, HW), lambda i: (i, 0, 0)),
            ),
            compiler_params=pltpu.CompilerParams(
                dimension_semantics=("parallel",),
                vmem_limit_bytes=vmem_limit),
        )(x3, w1a, w1m, w2)
    else:
        # ------ two pass: pool + in-kernel gate, then streaming scale -------
        w1at = jnp.asarray(w1[:C]).T       # (hidden, C)
        w1mt = jnp.asarray(w1[C:]).T       # (hidden, C)
        w2t = jnp.asarray(w2).T            # (C, hidden)

        THW = _pick_hw_tile(HW, C, itemsize, budget, max_hw_tile)
        T = pl.cdiv(HW, THW)
        mask_last = (HW % THW) != 0

        pool_kernel = functools.partial(
            _pool_gate_kernel, hw=HW, thw=THW, mask_last=mask_last)

        gate = pl.pallas_call(
            pool_kernel,
            out_shape=jax.ShapeDtypeStruct((B, C, 1), jnp.float32),
            grid_spec=pltpu.PrefetchScalarGridSpec(
                num_scalar_prefetch=0,
                grid=(B, T),
                in_specs=[
                    pl.BlockSpec((1, C, THW), lambda b, t: (b, 0, t)),
                    pl.BlockSpec((hidden, C), lambda b, t: (0, 0)),
                    pl.BlockSpec((hidden, C), lambda b, t: (0, 0)),
                    pl.BlockSpec((C, hidden), lambda b, t: (0, 0)),
                ],
                out_specs=pl.BlockSpec((1, C, 1), lambda b, t: (b, 0, 0)),
                scratch_shapes=[pltpu.VMEM((C, 1), jnp.float32),
                                pltpu.VMEM((C, 1), jnp.float32)],
            ),
            compiler_params=pltpu.CompilerParams(
                dimension_semantics=("parallel", "arbitrary"),
                vmem_limit_bytes=vmem_limit),
        )(x3, w1at, w1mt, w2t)

        out3 = pl.pallas_call(
            _scale_kernel,
            out_shape=jax.ShapeDtypeStruct((B, C, HW), x3.dtype),
            grid_spec=pltpu.PrefetchScalarGridSpec(
                num_scalar_prefetch=0,
                grid=(B, T),
                in_specs=[pl.BlockSpec((1, C, THW), lambda b, t: (b, 0, t)),
                          pl.BlockSpec((1, C, 1), lambda b, t: (b, 0, 0))],
                out_specs=pl.BlockSpec((1, C, THW), lambda b, t: (b, 0, t)),
            ),
            compiler_params=pltpu.CompilerParams(
                dimension_semantics=("parallel", "parallel"),
                vmem_limit_bytes=vmem_limit),
        )(x3, gate)

    return out3.reshape(B, C, H, W)


# ----------------------------------- main ------------------------------------

if __name__ == "__main__":
    def ref_se(x, w1, w2):
        avg = jnp.mean(x, axis=(2, 3))
        mx = jnp.max(x, axis=(2, 3))
        s = jnp.concatenate([avg, mx], axis=1)
        gate = jax.nn.sigmoid(jnp.maximum(s @ w1, 0.0) @ w2)
        return gate[:, :, None, None] * x

    def make_case(key, B, C, H, W, reduction=16):
        hidden = max(1, C // reduction)
        kx, k1, k2 = jax.random.split(key, 3)
        x = jax.random.normal(kx, (B, C, H, W), dtype=jnp.float32)
        # nn.Linear(2C, hidden).weight is (hidden, 2C); kernel uses transposed.
        w1 = (jax.random.normal(k1, (hidden, 2 * C), dtype=jnp.float32) * 0.1).T
        w2 = (jax.random.normal(k2, (C, hidden), dtype=jnp.float32) * 0.1).T
        return x, w1, w2

    root = jax.random.PRNGKey(0)
    ka, kb, kc = jax.random.split(root, 3)

    # Test 1: small SE(32, reduction=16) -> fused single-pass path.
    x, w1, w2 = make_case(ka, 2, 32, 16, 16)
    out = se_forward(x, w1, w2)
    jax.block_until_ready(out)
    assert jnp.allclose(out, ref_se(x, w1, w2), atol=1e-5, rtol=1e-5)

    # Test 2: SE(256) on a 64x64 map (4 MiB/slab) -> now inside the widened,
    # generation-aware fused window (1 read + 1 write instead of 3 passes).
    x, w1, w2 = make_case(kb, 2, 256, 64, 64)
    out = se_forward(x, w1, w2)
    jax.block_until_ready(out)
    assert jnp.allclose(out, ref_se(x, w1, w2), atol=2e-5, rtol=2e-5)

    # Test 3: force the tiled two-pass path at small shapes, with HW = 900
    # (not a multiple of 128) to exercise the pool+gate accumulation, the
    # masked partial last tile, and the streaming scale kernel.
    x, w1, w2 = make_case(kc, 2, 64, 30, 30)
    out = se_forward(x, w1, w2, max_fused_slab_bytes=0, max_hw_tile=256)
    jax.block_until_ready(out)
    assert jnp.allclose(out, ref_se(x, w1, w2), atol=2e-5, rtol=2e-5)

    print("KERNEL_OK")
</pallas_src>

<mosaic_0001>
module attributes {stable_mosaic.version = 11 : i64} {
  func.func @_se_fused_kernel(%arg0: i32, %arg1: memref<1x32x256xf32, #tpu.memory_space<vmem>>, %arg2: memref<32x2xf32, #tpu.memory_space<vmem>>, %arg3: memref<32x2xf32, #tpu.memory_space<vmem>>, %arg4: memref<2x32xf32, #tpu.memory_space<vmem>>, %arg5: memref<1x32x256xf32, #tpu.memory_space<vmem>>) attributes {dimension_semantics = [#tpu.dimension_semantics<parallel>], iteration_bounds = array<i64: 2>, scalar_prefetch = 0 : i64, scratch_operands = 0 : i64, tpu.core_type = #tpu.core_type<tc>, window_params = [{transform_indices = @transform_0, window_bounds = array<i64: 1, 32, 256>}, {pipeline_mode = #tpu.pipeline_mode<synchronous>, transform_indices = @transform_1, window_bounds = array<i64: 32, 2>}, {pipeline_mode = #tpu.pipeline_mode<synchronous>, transform_indices = @transform_2, window_bounds = array<i64: 32, 2>}, {pipeline_mode = #tpu.pipeline_mode<synchronous>, transform_indices = @transform_3, window_bounds = array<i64: 2, 32>}, {transform_indices = @transform_4, window_bounds = array<i64: 1, 32, 256>}]} {
    %c0 = arith.constant 0 : index
    %c0_0 = arith.constant 0 : index
    %c0_1 = arith.constant 0 : index
    %0 = vector.load %arg1[%c0, %c0_0, %c0_1] : memref<1x32x256xf32, #tpu.memory_space<vmem>>, vector<1x32x256xf32>
    %cst = arith.constant dense<0.000000e+00> : vector<1x32xf32>
    %1 = vector.multi_reduction <add>, %0, %cst [2] : vector<1x32x256xf32> to vector<1x32xf32>
    %cst_2 = arith.constant 3.906250e-03 : f32
    %2 = vector.broadcast %cst_2 : f32 to vector<1x32xf32>
    %3 = arith.mulf %1, %2 : vector<1x32xf32>
    %cst_3 = arith.constant dense<0xFF800000> : vector<1x32xf32>
    %4 = vector.multi_reduction <maximumf>, %0, %cst_3 [2] : vector<1x32x256xf32> to vector<1x32xf32>
    %c0_4 = arith.constant 0 : index
    %c0_5 = arith.constant 0 : index
    %5 = vector.load %arg2[%c0_4, %c0_5] : memref<32x2xf32, #tpu.memory_space<vmem>>, vector<32x2xf32>
    %cst_6 = arith.constant dense<0.000000e+00> : vector<1x2xf32>
    %6 = tpu.matmul %3, %5, %cst_6 {dimension_numbers = #tpu.dot_dimension_numbers<[1], [0], [0], [1], [0, 0, 1, 1], [], []>} : vector<1x32xf32>, vector<32x2xf32>, vector<1x2xf32> -> vector<1x2xf32>
    %c0_7 = arith.constant 0 : index
    %c0_8 = arith.constant 0 : index
    %7 = vector.load %arg3[%c0_7, %c0_8] : memref<32x2xf32, #tpu.memory_space<vmem>>, vector<32x2xf32>
    %cst_9 = arith.constant dense<0.000000e+00> : vector<1x2xf32>
    %8 = tpu.matmul %4, %7, %cst_9 {dimension_numbers = #tpu.dot_dimension_numbers<[1], [0], [0], [1], [0, 0, 1, 1], [], []>} : vector<1x32xf32>, vector<32x2xf32>, vector<1x2xf32> -> vector<1x2xf32>
    %9 = arith.addf %6, %8 : vector<1x2xf32>
    %cst_10 = arith.constant 0.000000e+00 : f32
    %10 = vector.broadcast %cst_10 : f32 to vector<1x2xf32>
    %11 = arith.maximumf %9, %10 : vector<1x2xf32>
    %c0_11 = arith.constant 0 : index
    %c0_12 = arith.constant 0 : index
    %12 = vector.load %arg4[%c0_11, %c0_12] : memref<2x32xf32, #tpu.memory_space<vmem>>, vector<2x32xf32>
    %cst_13 = arith.constant dense<0.000000e+00> : vector<1x32xf32>
    %13 = tpu.matmul %11, %12, %cst_13 {dimension_numbers = #tpu.dot_dimension_numbers<[1], [0], [0], [1], [0, 0, 1, 1], [], []>} : vector<1x2xf32>, vector<2x32xf32>, vector<1x32xf32> -> vector<1x32xf32>
    %14 = arith.negf %13 : vector<1x32xf32>
    %15 = math.exp %14 : vector<1x32xf32>
    %cst_14 = arith.constant 1.000000e+00 : f32
    %16 = vector.broadcast %cst_14 : f32 to vector<1x32xf32>
    %17 = arith.addf %16, %15 : vector<1x32xf32>
    %18 = arith.divf %16, %17 : vector<1x32xf32>
    %c0_15 = arith.constant 0 : index
    %c0_16 = arith.constant 0 : index
    %c0_17 = arith.constant 0 : index
    %19 = vector.load %arg1[%c0_15, %c0_16, %c0_17] : memref<1x32x256xf32, #tpu.memory_space<vmem>>, vector<1x32x256xf32>
    %20 = vector.shape_cast %18 : vector<1x32xf32> to vector<1x32x1xf32>
    %21 = vector.broadcast %20 : vector<1x32x1xf32> to vector<1x32x256xf32>
    %22 = arith.mulf %19, %21 : vector<1x32x256xf32>
    %c0_18 = arith.constant 0 : index
    %c0_19 = arith.constant 0 : index
    %c0_20 = arith.constant 0 : index
    %23 = vector.load %arg5[%c0_18, %c0_19, %c0_20] : memref<1x32x256xf32, #tpu.memory_space<vmem>>, vector<1x32x256xf32>
    tpu.vector_store %arg5[%c0_18, %c0_19, %c0_20], %22 {strides = array<i32>} : memref<1x32x256xf32, #tpu.memory_space<vmem>>, vector<1x32x256xf32>,
    return
  }
  func.func @transform_0(%arg0: i32) -> (i32, i32, i32) {
    %c0_i32 = arith.constant 0 : i32
    %c0_i32_0 = arith.constant 0 : i32
    %c0_i32_1 = arith.constant 0 : i32
    return %arg0, %c0_i32, %c0_i32_0 : i32, i32, i32
  }
  func.func @transform_1(%arg0: i32) -> (i32, i32) {
    %c0_i32 = arith.constant 0 : i32
    %c0_i32_0 = arith.constant 0 : i32
    %c0_i32_1 = arith.constant 0 : i32
    return %c0_i32, %c0_i32_0 : i32, i32
  }
  func.func @transform_2(%arg0: i32) -> (i32, i32) {
    %c0_i32 = arith.constant 0 : i32
    %c0_i32_0 = arith.constant 0 : i32
    %c0_i32_1 = arith.constant 0 : i32
    return %c0_i32, %c0_i32_0 : i32, i32
  }
  func.func @transform_3(%arg0: i32) -> (i32, i32) {
    %c0_i32 = arith.constant 0 : i32
    %c0_i32_0 = arith.constant 0 : i32
    %c0_i32_1 = arith.constant 0 : i32
    return %c0_i32, %c0_i32_0 : i32, i32
  }
  func.func @transform_4(%arg0: i32) -> (i32, i32, i32) {
    %c0_i32 = arith.constant 0 : i32
    %c0_i32_0 = arith.constant 0 : i32
    %c0_i32_1 = arith.constant 0 : i32
    return %arg0, %c0_i32, %c0_i32_0 : i32, i32, i32
  }
}

</mosaic_0001>

<bundles_post_ra>
// kernel: tpu_custom_call.1
= control target key start
LH: loop header
LB: loop body
LE: loop exit
PB: predicated region body
PF: predicated region fallthrough
CT: control target
= control target key end

     0   :  { %9 = vsyncpa [#allocation3], 0  ;;  %s1169_s0 = inlined_call_operand.hbm [shape: f32[2,32,256], index: 0, kind: input, shape index: {}]   ;;  %s1170_s1 = inlined_call_operand.vmem [shape: f32[32,2], index: 1, kind: input, shape index: {}]   ;;  %s1171_s2 = inlined_call_operand.vmem [shape: f32[32,2], index: 2, kind: input, shape index: {}]   ;;  %s1172_s3 = inlined_call_operand.vmem [shape: f32[2,32], index: 3, kind: input, shape index: {}]   ;;  %s1173_s4 = inlined_call_operand.hbm [shape: f32[2,32,256], index: 4, kind: output, shape index: {}]  }
   0x1   :  { %11 = vsyncpa [#allocation3 + $0x1], 0 }
   0x2   :  { %12 = vsyncpa [#allocation4], 0 }
   0x3   :  { %14 = vsyncpa [#allocation4 + $0x1], 0  ;;  %s929_s15 = smov 0   ;;  %s931_s16 = smov 0  }
   0x4   :  { %s933_s17 = smov 0   ;;  %s935_s18 = smov 0  }
   0x5 LB: > { %s950_s19 = sadd.s32 4294967295, %s893_s18   ;;  %s667_s20 = sadd.s32 4294967294, %s893_s18   ;;  %s893_s18 = sphi %s935_s18, %s1186_s18   ;;  %s889_s17 = sphi %s933_s17, %s1185_s17   ;;  %s885_s16 = sphi %s931_s16, %s1184_s16   ;;  %s881_s15 = sphi %s929_s15, %s1183_s15  }
   0x6   : > { %s954_s21 = sadd.s32 1, %s893_s18   ;;  %s27_s22 = sadd.s32 1, %s889_s17 }
   0x7   : > { %s24_s23 = ssub.s32 %s893_s18, %s954_s21  ;;  %p34_p0 = scmp.ne.s32.totalorder %s889_s17, %s885_s16 }
   0x8   : > { %p25_p1 = scmp.eq.s32.totalorder %s24_s23, 0  ;;  %p35_p2 = scmp.eq.s32.totalorder %s893_s18, 0 }
   0x9   : > { %p40_p3 = scmp.ne.s32.totalorder %s885_s16, %s881_s15  ;;  %p41_p4 = scmp.eq.s32.totalorder %s950_s19, 0 }
   0xa   : > { %s966_s24 = scalar_select %p25_p1, %s889_s17, %s27_s22  }
   0xb   : > { %p968_p5 = por %p35_p2, %p34_p0  ;;  %p972_p6 = por %p41_p4, %p40_p3 }
   0xc   : > { %p127_p7 = scmp.eq.s32.totalorder %s950_s19, 1  ;;  %p133_p8 = scmp.eq.s32.totalorder %s667_s20, 1 }
   0xd   : > { %p752_p10 = scmp.lt.s32.totalorder %s893_s18, 2  ;;  %s162_s29 = sand.u32 1, %s889_s17  }
   0xe   : > { %p979_p11 = por %p127_p7, %p34_p0  ;;  %p983_p12 = por %p133_p8, %p40_p3 }
   0xf   : > { %s686_s30 = sshll.u32 %s893_s18, 10  ;;  %s670_s5 = sshll.u32 %s162_s29, 6 }
  0x10   : > { %s1177_s27 = scalar_select %p979_p11, 1, 0 }
  0x11   : > { %s1178_s28 = scalar_select %p983_p12, 1, 0 }
  0x12   : > { %s992_s8 = scalar_lea.hbm %s1169_s0, %s686_s30  ;;  %s166_s9 = scalar_lea.vmem [#allocation2], %s670_s5 }
  0x13   : > { %s173_s10 = sshll.u32 %s166_s9, 4  ;;  %p996_p13 = pnand %p752_p10, %p968_p5  ;;  %s1000_s10 = int_to_ptr.vmem [resolvable:$true] %s173_s10 }
  0x14   : > { %s1002_s12 = scalar_lea.sflag [#allocation3], %s162_s29  ;;  %s797_s13 = scalar_lea.hbm %s992_s8, 1024 }
  0x15   : > { %p798_p0 = scmp.ne.s32.totalorder %s992_s8, %s797_s13  ;;  %p799_p1 = pneg %p996_p13 }
  0x16   : > { %s802_s22 = scalar_lea.hbm %s1169_s0, 2048  ;;  %p803_p4 = scmp.lt.u32.totalorder %s992_s8, %s1169_s0 }
  0x17   : > { %p800_p2 = pnand %p799_p1, %p798_p0  ;;  %p804_p5 = scmp.lt.u32.totalorder %s802_s22, %s797_s13 }
  0x18   : > { %p806_p8 = scmp.lt.u32.totalorder %s797_s13, %s992_s8 }
  0x19   : > { %p801_p3 = pneg %p800_p2  ;;  %p805_p7 = por %p804_p5, %p803_p4 }
  0x1b   : > { %p807_p10 = por %p806_p8, %p805_p7 }
  0x1d   : > { %p808_p9 = pnand %p807_p10, %p801_p3 }
  0x1f   : > { %811 = shalt.err (!%p808_p9)
}
  0x20   : > { %s812_s29 = scalar_lea.vmem %s1000_s10, 1024  ;;  %s895_s30 = smov [#allocation2]  }
  0x21   : > { %p813_p0 = scmp.ne.s32.totalorder %s1000_s10, %s812_s29  ;;  %s817_s5 = sshll.u32 %s895_s30, 4  ;;  %s818_s5 = int_to_ptr.vmem [resolvable:$false] %s817_s5 }
  0x22   : > { %s819_s6 = scalar_lea.vmem %s818_s5, 2048  ;;  %p820_p11 = scmp.lt.s32.totalorder %s1000_s10, %s818_s5 }
  0x23   : > { %p815_p2 = pnand %p813_p0, %p799_p1  ;;  %p821_p4 = scmp.lt.s32.totalorder %s819_s6, %s812_s29 }
  0x25   : > { %p816_p12 = pneg %p815_p2  ;;  %p822_p5 = por %p821_p4, %p820_p11 }
  0x27   : > { %p823_p7 = pnand %p822_p5, %p816_p12 }
  0x29   : > { %826 = shalt.err (!%p823_p7)
}
  0x2a   : > { %s896_s7 = smov 256   ;;  %s897_s9 = smov 16  }
  0x2b   : > { %747 = dma.hbm_to_vmem [thread:$0]  (!%p996_p13), %s992_s8, 1024, %s1000_s10, %s1002_s12, %s896_s7, %s896_s7, %s897_s9  }
  0x2c   : > { %p673_p9 = scmp.ge.s32.totalorder %s893_s18, 1  ;;  %p181_p1 = scmp.lt.s32.totalorder %s893_s18, 3 }
  0x2e   : > { %p182_p3 = pnand %p673_p9, %p181_p1 }
  0x2f   : > { %s1033_s13 = sand.u32 (!%p182_p3), 1, %s885_s16  }
  0x30   : > { %185 = sbr.rel (%p182_p3) target bundleno = 814 (0x32e), region = 36  ;;  %s674_s14 = sshll.u32 (!%p182_p3), %s1033_s13, 6 }
  0x31   : > { %s188_s20 = scalar_lea.sflag (!%p182_p3), [#allocation3], %s1033_s13  ;;  %s191_s22 = scalar_lea.vmem (!%p182_p3), [#allocation2], %s674_s14 }
  0x37   : > { %872 = dma.done.wait (%p972_p6), %s188_s20, 1024  }
  0x38   : > { %874 = vsyncadd (%p972_p6), %s188_s20, 4294966272  ;;  %v1043_v0 = vld [vmem:[%s191_s22 + $0x20] sm:$0xff]  ;;  %v1045_v1 = vld [vmem:[%s191_s22 + $0x28] sm:$0xff]  ;;  %v898_v19 = vmov 0.0|0.0   ;;  %vm899_vm0 = vmmov 0   ;;  %v900_v26 = vmov 0.0   ;;  %v264_v30 = vlaneseq }
  0x39   : > { %v1047_v2 = vld [vmem:[%s191_s22] sm:$0xff]  ;;  %v230_v3 = vadd.f32 %v1045_v1, %v1043_v0  ;;  %v1051_v4 = vld [vmem:[%s191_s22 + $0x8] sm:$0xff]  ;;  %v1053_v5 = vld [vmem:[%s191_s22 + $0x30] sm:$0xff]  ;;  %v246_v15 = vmax.f32 %v1043_v0, %v1045_v1  ;;  %733 = vmatprep.subr.bf16.mxu0 %v898_v19  ;;  %727 = vmatprep.subr.bf16.mxu1 %v898_v19  ;;  %vm275_vm1 = vcmask 130112   ;;  %vm282_vm2 = vcmask 195712   ;;  %s215_s11 = scalar_lea.vmem [#allocation5], %s674_s14 }
  0x3a   : > { %v1055_v6 = vld [vmem:[%s191_s22 + $0x38] sm:$0xff]  ;;  %v224_v7 = vadd.f32 %v1051_v4, %v1047_v2  ;;  %v1059_v8 = vld [vmem:[%s191_s22 + $0x10] sm:$0xff]  ;;  %v240_v13 = vmax.f32 %v1047_v2, %v1051_v4  ;;  %v252_v16 = vld [vmem:[%s1170_s1] sm:$0xff]  ;;  %719 = vmatprep.mubr.msk.f32.mxu0 %vm899_vm0, %v900_v26  ;;  %708 = vmatprep.mubr.msk.f32.mxu1 %vm899_vm0, %v900_v26  ;;  %v265_v31 = vand.u32 127, %v264_v30  ;;  %v267_v32 = vshrl.u32 %v264_v30, 7  ;;  %s594_s12 = sshll.u32 %s215_s11, 4  ;;  %s1118_s12 = int_to_ptr.vmem [resolvable:$true] %s594_s12 }
  0x3b   : > { %v1061_v9 = vld [vmem:[%s191_s22 + $0x18] sm:$0xff]  ;;  %231 = vadd.xlane.f32.xlu1 %v230_v3  ;;  %v233_v10 = vadd.f32 %v1055_v6, %v1053_v5  ;;  %v249_v14 = vmax.f32 %v1053_v5, %v1055_v6  ;;  %v253_v17 = vld [vmem:[%s1170_s1 + $0x8] sm:$0xff]  ;;  %v254_v20 = vld [vmem:[%s1170_s1 + $0x10] sm:$0xff]  ;;  %vm289_vm3 = vcmask 261312   ;;  %vm291_vm4 = vcmask 261120   ;;  %s687_s23 = sshll.u32 %s950_s19, 10 }
  0x3c   : > { %225 = vadd.xlane.f32.xlu0 %v224_v7  ;;  %v227_v11 = vadd.f32 %v1061_v9, %v1059_v8  ;;  %v243_v12 = vmax.f32 %v1059_v8, %v1061_v9  ;;  %v734_v18 = vpack.c.bf16 %v253_v17, %v252_v16  ;;  %v255_v21 = vld [vmem:[%s1170_s1 + $0x18] sm:$0xff]  ;;  %v256_v23 = vld [vmem:[%s1171_s2] sm:$0xff]  ;;  %v257_v24 = vld [vmem:[%s1171_s2 + $0x8] sm:$0xff]  ;;  %v284_v34 = vadd.s32 4294967272, %v265_v31  ;;  %s1123_s29 = scalar_lea.hbm %s1173_s4, %s687_s23  ;;  %s581_s19 = scalar_lea.sflag [#allocation4], %s1033_s13 }
  0x3d   : > { %v737_v22 = vpack.c.bf16 %v255_v21, %v254_v20  ;;  %v728_v25 = vpack.c.bf16 %v257_v24, %v256_v23  ;;  %v258_v27 = vld [vmem:[%s1171_s2 + $0x10] sm:$0xff]  ;;  %v259_v28 = vld [vmem:[%s1171_s2 + $0x18] sm:$0xff]  ;;  %v270_v35 = vadd.s32 4294967288, %v265_v31  ;;  %v277_v36 = vadd.s32 4294967280, %v265_v31  ;;  %s827_s30 = scalar_lea.vmem %s1118_s12, 1024  ;;  %p1180_p11 = scmp.ne.s32.totalorder %s1177_s27, 0 }
  0x3e   : > { %735 = vmatpush3.bf16.msra.mxu0 %v734_v18  ;;  %v731_v29 = vpack.c.bf16 %v259_v28, %v258_v27  ;;  %v268_v38 = vsub.s32 %v265_v31, %v267_v32  ;;  %v287_v40 = vsub.s32 %v284_v34, %v267_v32  ;;  %vm465_vm5 = vcmask 1041408   ;;  %p828_p6 = scmp.ne.s32.totalorder %s1118_s12, %s827_s30  ;;  %s901_s5 = smov [#allocation5]  }
  0x3f   : > { %234 = vadd.xlane.f32.xlu1 %v233_v10  ;;  %736 = vmatprep.subr.bf16.mxu0 %v898_v19  ;;  %v273_v42 = vsub.s32 %v270_v35, %v267_v32  ;;  %v280_v43 = vsub.s32 %v277_v36, %v267_v32  ;;  %v460_v10 = vld [vmem:[%s1172_s3] sm:$0x3]  ;;  %vm461_vm6 = vcmask 15360   ;;  %s831_s6 = sshll.u32 %s901_s5, 4  ;;  %s832_s6 = int_to_ptr.vmem [resolvable:$false] %s831_s6 }
  0x40   : > { %228 = vadd.xlane.f32.xlu0 %v227_v11  ;;  %729 = vmatpush3.bf16.msra.mxu1 %v728_v25  ;;  %p829_p12 = pnand %p828_p6, %p1180_p11  ;;  %s833_s7 = scalar_lea.vmem %s832_s6, 2048 }
  0x41   : > { %730 = vmatprep.subr.bf16.mxu1 %v898_v19  ;;  %p834_p8 = scmp.lt.s32.totalorder %s1118_s12, %s832_s6  ;;  %p835_p10 = scmp.lt.s32.totalorder %s833_s7, %s827_s30 }
  0x42   : > { %738 = vmatpush3.bf16.msra.mxu0 %v737_v22  ;;  %v547_v22 = vsub.s32 0, %v267_v32  ;;  %p830_p13 = pneg %p829_p12 }
  0x43   : > { %244 = vmax.xlane.f32.xlu1 %v243_v12  ;;  %p836_p0 = por %p835_p10, %p834_p8 }
  0x44   : > { %241 = vmax.xlane.f32.xlu0 %v240_v13  ;;  %732 = vmatpush3.bf16.msra.mxu1 %v731_v29 }
  0x45   : > { %722 = vmatprep.subr.mxu1 %v900_v26  ;;  %p837_p2 = pnand %p836_p0, %p830_p13 }
  0x47   : > { %250 = vmax.xlane.f32.xlu1 %v249_v14 }
  0x48   : > { %247 = vmax.xlane.f32.xlu0 %v246_v15 }
  0xc8   : > { %v232_v33 = vpop.xlane.xlu1 %231 }
  0xc9   : > { %v226_v37 = vpop.xlane.xlu0 %225  ;;  %v238_v44 = vmul.f32 0.00390625, %v232_v33 }
  0xca   : > { %v236_v39 = vmul.f32 0.00390625, %v226_v37 }
  0xcb   : > { %v380_v52 = vrot.slane %v238_v44, %v280_v43 }
  0xcc   : > { %v235_v41 = vpop.xlane.xlu1 %234  ;;  %v371_v48 = vrot.slane %v236_v39, %v268_v38 }
  0xcd   : > { %v239_v45 = vmul.f32 0.00390625, %v235_v41  ;;  %v229_v46 = vpop.xlane.xlu0 %228 }
  0xce   : > { %v237_v47 = vmul.f32 0.00390625, %v229_v46 }
  0xcf   : > { %v385_v49 = vrot.slane %v239_v45, %v287_v40 }
  0xd0   : > { %v375_v50 = vrot.slane %v237_v47, %v273_v42  ;;  %v245_v51 = vpop.xlane.xlu1 %244 }
  0xd1   : > { %v242_v53 = vpop.xlane.xlu0 %241  ;;  %v274_v55 = vrot.slane %v245_v51, %v273_v42 }
  0xd2   : > { %v376_v54 = vsel %vm275_vm1, %v375_v50, %v371_v48  ;;  %v269_v56 = vrot.slane %v242_v53, %v268_v38 }
  0xd3   : > { %v381_v57 = vsel %vm282_vm2, %v380_v52, %v376_v54 }
  0xd4   : > { %v386_v58 = vsel %vm289_vm3, %v385_v49, %v381_v57  ;;  %v251_v59 = vpop.xlane.xlu1 %250  ;;  %v276_v63 = vsel %vm275_vm1, %v274_v55, %v269_v56 }
  0xd5   : > { %720 = vmatmul.mubr.msk.f32.vlgmr.msra.gmra.mrb[0].mxu0 %vm291_vm4, %v386_v58  ;;  %v248_v60 = vpop.xlane.xlu0 %247  ;;  %v288_v61 = vrot.slane %v251_v59, %v287_v40 }
  0xd6   : > { %v281_v62 = vrot.slane %v248_v60, %v280_v43 }
  0xd8   : > { %v283_v3 = vsel %vm282_vm2, %v281_v62, %v276_v63 }
  0xd9   : > { %v290_v7 = vsel %vm289_vm3, %v288_v61, %v283_v3 }
  0xda   : > { %709 = vmatmul.mubr.msk.f32.vlgmr.msra.gmra.mrb[0].mxu1 %vm291_vm4, %v290_v7 }
  0xdb   : > { %724 = vmatprep.mubr.msk.f32.mxu1 %vm899_vm0, %v900_v26  ;;  %723 = vmatpush3.msk.msra.mxu1 %vm465_vm5, %v460_v10 }
 0x1a8   : > { %v455_v11 = vpop.f32.mrb[0].mxu0 }
 0x1a9   : > { %v721_v12 = vpop.f32.mrb[1].mxu0 }
 0x1ad   : > { %v360_v13 = vpop.f32.mrb[0].mxu1 }
 0x1ae   : > { %v456_v14 = vadd.f32 %v455_v11, %v360_v13  ;;  %v710_v15 = vpop.f32.mrb[1].mxu1 }
 0x1b0   : > { %v459_v16 = vmax.f32 %v456_v14, 0.0 }
 0x1b2   : > { %725 = vmatmul.mubr.msk.f32.vlgmr.msra.gmra.mrb[2].mxu1 %vm461_vm6, %v459_v16 }
 0x285   : > { %v535_v17 = vpop.f32.mrb[2].mxu1 }
 0x286   : > { %v680_v18 = vmul.f32 -1.442695, %v535_v17  ;;  %v726_v19 = vpop.f32.mrb[3].mxu1 }
 0x288   : > { %793 = vpow2.f32 %v680_v18 }
 0x292   : > { %v794_v20 = vpop.eup %793 }
 0x293   : > { %v542_v21 = vadd.f32 1.0, %v794_v20 }
 0x295   : > { %795 = vrcp.f32 %v542_v21 }
 0x29f   : > { %v796_v23 = vpop.eup %795 }
 0x2a0   : > { %v548_v24 = vrot.slane %v796_v23, %v547_v22 }
 0x2a2   : > { %554 = vbcast.lane.b32.xlu1 %v548_v24, 264  ;;  %550 = vbcast.lane.b32.xlu0 %v548_v24, 256 }
 0x2a6   : > { %558 = vbcast.lane.b32.xlu1 %v548_v24, 272 }
 0x2aa   : > { %562 = vbcast.lane.b32.xlu1 %v548_v24, 280 }
 0x314   : > { %v555_v25 = vpop.permute.xlu1 %554  ;;  %v551_v26 = vpop.permute.xlu0 %550 }
 0x315   : > { %v566_v27 = vmul.f32 %v555_v25, %v1059_v8  ;;  %v567_v28 = vmul.f32 %v555_v25, %v1061_v9  ;;  %v564_v29 = vmul.f32 %v551_v26, %v1047_v2  ;;  %v565_v30 = vmul.f32 %v551_v26, %v1051_v4 }
 0x317   : > { %574 = vst [vmem:[%s215_s11 + $0x10] sm:$0xff] %v566_v27  ;;  %575 = vst [vmem:[%s215_s11 + $0x18] sm:$0xff] %v567_v28 }
 0x318   : > { %572 = vst [vmem:[%s215_s11] sm:$0xff] %v564_v29  ;;  %573 = vst [vmem:[%s215_s11 + $0x8] sm:$0xff] %v565_v30  ;;  %v559_v31 = vpop.permute.xlu1 %558 }
 0x319   : > { %v568_v32 = vmul.f32 %v559_v31, %v1043_v0  ;;  %v569_v8 = vmul.f32 %v559_v31, %v1045_v1 }
 0x31b   : > { %576 = vst [vmem:[%s215_s11 + $0x20] sm:$0xff] %v568_v32  ;;  %577 = vst [vmem:[%s215_s11 + $0x28] sm:$0xff] %v569_v8 }
 0x31c   : > { %v563_v2 = vpop.permute.xlu1 %562 }
 0x31d   : > { %v570_v4 = vmul.f32 %v563_v2, %v1053_v5  ;;  %v571_v0 = vmul.f32 %v563_v2, %v1055_v6 }
 0x31f   : > { %578 = vst [vmem:[%s215_s11 + $0x30] sm:$0xff] %v570_v4  ;;  %579 = vst [vmem:[%s215_s11 + $0x38] sm:$0xff] %v571_v0 }
 0x320   : > { %840 = shalt.err (!%p837_p2)
}
 0x321   : > { %s841_s9 = scalar_lea.hbm %s1123_s29, 1024  ;;  %s845_s26 = scalar_lea.hbm %s1173_s4, 2048 }
 0x322   : > { %p842_p4 = scmp.ne.s32.totalorder %s1123_s29, %s841_s9  ;;  %p846_p9 = scmp.lt.u32.totalorder %s1123_s29, %s1173_s4 }
 0x323   : > { %p847_p1 = scmp.lt.u32.totalorder %s845_s26, %s841_s9  ;;  %p849_p6 = scmp.lt.u32.totalorder %s841_s9, %s1123_s29 }
 0x324   : > { %p843_p5 = pnand %p842_p4, %p1180_p11 }
 0x325   : > { %p848_p3 = por %p847_p1, %p846_p9 }
 0x326   : > { %p844_p7 = pneg %p843_p5 }
 0x327   : > { %p850_p12 = por %p849_p6, %p848_p3 }
 0x329   : > { %p851_p13 = pnand %p850_p12, %p844_p7 }
 0x32b   : > { %854 = shalt.err (!%p851_p13)
}
 0x32c   : > { %s902_s11 = smov 256   ;;  %s903_s23 = smov 16  }
 0x32d   : > { %742 = dma.vmem_to_hbm [thread:$0]  (%p1180_p11), %s1118_s12, 1024, %s1123_s29, %s581_s19, %s902_s11, %s902_s11, %s903_s23  }
 0x32e PF: > { %s609_s14 = sand.u32 1, %s881_s15   ;;  %p1181_p8 = scmp.ne.s32.totalorder %s1178_s28, 0 }
 0x32f   : > { %p1182_p10 = scmp.ge.s32.totalorder %s893_s18, 2  ;;  %s610_s25 = scalar_lea.sflag [#allocation4], %s609_s14 }
 0x331   : > { %p749_p0 = pnand %p1182_p10, %p1181_p8 }
 0x333   : > { %876 = dma.done.wait (!%p749_p0), %s610_s25, 1024  }
 0x334   : > { %878 = vsyncadd (!%p749_p0), %s610_s25, 4294966272  ;;  %p17_p2 = scmp.ge.s32.totalorder %s954_s21, 4   ;;  %s1183_s15 = smov %s885_s16 }
 0x335   : > { %s1184_s16 = smov %s889_s17  ;;  %s1185_s17 = smov %s966_s24 }
 0x336   : > { %s1186_s18 = smov %s954_s21  ;;  %19 = sbr.rel (!%p17_p2) target bundleno = 5 (0x5), region = 81 }
 0x33d   :  { %615 = vsyncpa [#allocation3], 1 }
 0x33e   :  { %617 = vsyncpa [#allocation3 + $0x1], 1 }
 0x33f   :  { %618 = vsyncpa [#allocation4], 1 }
 0x340   :  { %620 = vsyncpa [#allocation4 + $0x1], 1 }

</bundles_post_ra>
